<compile_context>
chip_gen: v7x
topology: tpu7x:2x2x1
jax: 0.10.0
libtpu: 0.0.40
codegen_flags: <defaults>
</compile_context>

<pallas_src>
import numpy as np

import jax
import jax.numpy as jnp
from jax.experimental import pallas as pl
from jax.experimental.pallas import tpu as pltpu

EPS = 1e-5
OFF = 8  # 8-row-aligned offset of the conv1 output inside the padded scratch


def basic_block_kernel(xp_ref, w1b_ref, w2b_ref, fold_ref, unfold_ref,
                       g1_ref, be1_ref, g2_ref, be2_ref, out_ref, h1pad_ref):
    # xp_ref    : (N, H+2, W*C) f32   H-zero-padded input, lane index = w*C + c
    # w1b_ref   : (3, W*C, W*P) bf16  banded conv1 weights, one slice per H tap
    # w2b_ref   : (3, W*P, W*P) bf16  banded conv2 weights
    # fold_ref  : (W*P, P) f32        lane -> channel reduction matrix
    # unfold_ref: (P, W*P) f32        channel -> lane broadcast matrix
    # g*/be*    : (1, P) f32          BN gamma / beta
    # out_ref   : (N, H, W*P) f32
    # h1pad_ref : (N, Hpad, W*P) f32  scratch; conv1 output lives at rows OFF..OFF+H-1
    N, Hp2, WC = xp_ref.shape
    H = Hp2 - 2
    M = N * H
    WP = out_ref.shape[-1]
    P = fold_ref.shape[-1]
    W = WP // P
    inv_count = 1.0 / float(M * W)

    def conv3x3(src_bf16, wband_ref):
        # src_bf16: (N, H+2, lanes) bf16. Three H-shifted taps -> three
        # accumulating MXU matmuls (no concat slab, f32 accumulation).
        L = src_bf16.shape[-1]
        acc = jnp.dot(src_bf16[:, 0:H, :].reshape(M, L), wband_ref[0],
                      preferred_element_type=jnp.float32)
        acc += jnp.dot(src_bf16[:, 1:H + 1, :].reshape(M, L), wband_ref[1],
                       preferred_element_type=jnp.float32)
        acc += jnp.dot(src_bf16[:, 2:H + 2, :].reshape(M, L), wband_ref[2],
                       preferred_element_type=jnp.float32)
        return acc                                                   # (M, WP) f32

    def batchnorm(acc, g_ref, be_ref):
        # One-pass per-channel stats in f32; fold and unfold each fused to one dot.
        lane_stats = jnp.concatenate(
            [jnp.sum(acc, axis=0, keepdims=True),
             jnp.sum(acc * acc, axis=0, keepdims=True)], axis=0)     # (2, WP)
        ch_stats = jnp.dot(lane_stats, fold_ref[...],
                           preferred_element_type=jnp.float32) * inv_count  # (2, P)
        mean, ex2 = ch_stats[0:1], ch_stats[1:2]
        var = ex2 - mean * mean
        scale_c = g_ref[...] * jax.lax.rsqrt(var + EPS)              # (1, P)
        shift_c = be_ref[...] - mean * scale_c                       # (1, P)
        ss_lane = jnp.dot(jnp.concatenate([scale_c, shift_c], axis=0),
                          unfold_ref[...],
                          preferred_element_type=jnp.float32)        # (2, WP)
        return acc * ss_lane[0:1] + ss_lane[1:2]

    # ---- conv1 + bn1 + relu (bf16 matmul operands, f32 everything else) -----
    x_bf = xp_ref[...].astype(jnp.bfloat16)
    h1 = jnp.maximum(batchnorm(conv3x3(x_bf, w1b_ref), g1_ref, be1_ref), 0.0)

    # ---- H-pad conv1 output into scratch: data store is 8-row aligned -------
    zero_row = jnp.zeros((N, 1, WP), jnp.float32)
    h1pad_ref[:, OFF - 1:OFF, :] = zero_row                 # top halo row
    h1pad_ref[:, OFF + H:OFF + H + 1, :] = zero_row         # bottom halo row
    h1pad_ref[:, OFF:OFF + H, :] = h1.reshape(N, H, WP)     # unmasked aligned store

    # ---- conv2 + bn2 ----------------------------------------------------------
    h1_bf = h1pad_ref[:, OFF - 1:OFF + H + 1, :].astype(jnp.bfloat16)  # (N, H+2, WP)
    h2 = batchnorm(conv3x3(h1_bf, w2b_ref), g2_ref, be2_ref)

    # ---- residual add (identity = f32 interior of the padded input) + relu ---
    ident = xp_ref[:, 1:H + 1, :].reshape(M, WC)
    out_ref[...] = jnp.maximum(h2 + ident, 0.0).reshape(N, H, WP)


def _band_weights(w_oihw, W):
    """Fold the 3 W-direction taps (and the W zero padding) of a 3x3 conv into a
    (3, W*Cin, W*Cout) banded weight stack (one slice per H tap) so each conv is
    three accumulating matmuls over the lane-dense (w, c) layout."""
    Cout, Cin, KH, KW = w_oihw.shape
    w_hkio = jnp.transpose(w_oihw, (2, 3, 1, 0)).astype(jnp.float32)   # (kh,kw,ci,co)
    sel = np.zeros((KW, W, W), np.float32)        # sel[kw, wi, w] = [wi == w + kw - 1]
    for kw in range(KW):
        for w in range(W):
            wi = w + kw - 1
            if 0 <= wi < W:
                sel[kw, wi, w] = 1.0
    band = jnp.einsum('kab,hkio->haibo', jnp.asarray(sel), w_hkio)     # (kh,wi,ci,w,co)
    return band.reshape(KH, W * Cin, W * Cout).astype(jnp.bfloat16)


def basic_block(x_nchw, w1_oihw, g1, b1, w2_oihw, g2, b2):
    """Fused BasicBlock forward. x_nchw: (N, C, H, W) f32 -> (N, P, H, W)."""
    N, C, H, W = x_nchw.shape
    P = w1_oihw.shape[0]
    assert C == P, "identity residual requires inplanes == planes (downsample=None)"
    WC, WP = W * C, W * P
    assert WC == 128 and WP == 128, \
        "banded lane-dense layout assumes W*C == W*P == 128 (small-C case only)"
    # TODO(synk): for C >= 32 / production widths switch to a channel-on-lane
    # layout (lane = C padded to 128, K = 9*C im2col), add a grid tiled over N /
    # H-row blocks with a 1-row halo, split BN into a stats pass + normalize pass,
    # and mark the row-block axis "parallel" (megacore) with tiles re-sized for
    # v7x's 64 MiB VMEM; the banded-weight trick does not scale past W*C = 128.

    # Lane-dense activation layout: (N, H, W*C), H zero-padded by 1 on each side.
    x_lanes = jnp.transpose(x_nchw, (0, 2, 3, 1)).astype(jnp.float32).reshape(N, H, WC)
    xp = jnp.pad(x_lanes, ((0, 0), (1, 1), (0, 0)))

    w1b = _band_weights(w1_oihw, W)                                    # (3, W*C, W*P)
    w2b = _band_weights(w2_oihw, W)                                    # (3, W*P, W*P)
    fold = jnp.asarray(np.tile(np.eye(P, dtype=np.float32), (W, 1)))   # (W*P, P)
    unfold = fold.T                                                    # (P, W*P)

    h_scratch = ((OFF + H + 1 + 7) // 8) * 8     # rows 0..OFF+H, rounded to 8

    vmem = pl.BlockSpec(memory_space=pltpu.MemorySpace.VMEM)
    out = pl.pallas_call(
        basic_block_kernel,
        out_shape=jax.ShapeDtypeStruct((N, H, WP), jnp.float32),
        in_specs=[vmem] * 9,
        out_specs=vmem,
        scratch_shapes=[pltpu.VMEM((N, h_scratch, WP), jnp.float32)],
        compiler_params=pltpu.CompilerParams(vmem_limit_bytes=32 * 1024 * 1024),
    )(xp, w1b, w2b, fold, unfold,
      g1.reshape(1, P).astype(jnp.float32), b1.reshape(1, P).astype(jnp.float32),
      g2.reshape(1, P).astype(jnp.float32), b2.reshape(1, P).astype(jnp.float32))

    return jnp.transpose(out.reshape(N, H, W, P), (0, 3, 1, 2))  # back to NCHW


def ref_basic_block(x, w1, g1, b1, w2, g2, b2):
    """Pure-JAX f32 reference (NCHW, matches PyTorch BasicBlock, training-mode BN)."""
    def conv(x, w):
        return jax.lax.conv_general_dilated(
            x, w, window_strides=(1, 1), padding=((1, 1), (1, 1)),
            dimension_numbers=("NCHW", "OIHW", "NCHW"))

    def bn(x, g, b):
        mean = jnp.mean(x, axis=(0, 2, 3), keepdims=True)
        var = jnp.mean((x - mean) ** 2, axis=(0, 2, 3), keepdims=True)
        return ((x - mean) * jax.lax.rsqrt(var + EPS)
                * g.reshape(1, -1, 1, 1) + b.reshape(1, -1, 1, 1))

    out = jax.nn.relu(bn(conv(x, w1), g1, b1))
    out = bn(conv(out, w2), g2, b2)
    return jax.nn.relu(out + x)


if __name__ == "__main__":
    key = jax.random.PRNGKey(0)
    k = jax.random.split(key, 7)

    N, C, H, W = 2, 8, 16, 16      # inplanes == planes (downsample=None, stride=1)
    P = C                          # W * C = 128 -> fully lane-dense layout

    x = jax.random.normal(k[0], (N, C, H, W), jnp.float32)
    w1 = 0.1 * jax.random.normal(k[1], (P, C, 3, 3), jnp.float32)   # conv1 (OIHW)
    w2 = 0.1 * jax.random.normal(k[2], (P, P, 3, 3), jnp.float32)   # conv2 (OIHW)
    g1 = 1.0 + 0.1 * jax.random.normal(k[3], (P,), jnp.float32)     # bn1 gamma
    b1 = 0.1 * jax.random.normal(k[4], (P,), jnp.float32)           # bn1 beta
    g2 = 1.0 + 0.1 * jax.random.normal(k[5], (P,), jnp.float32)     # bn2 gamma
    b2 = 0.1 * jax.random.normal(k[6], (P,), jnp.float32)           # bn2 beta

    out = jax.block_until_ready(basic_block(x, w1, g1, b1, w2, g2, b2))
    ref = jax.block_until_ready(ref_basic_block(x, w1, g1, b1, w2, g2, b2))

    assert out.shape == (N, P, H, W), out.shape
    # bf16 MXU operands (f32 accumulation) -> relaxed tolerance vs the f32 reference.
    max_err = float(jnp.max(jnp.abs(out - ref)))
    mean_err = float(jnp.mean(jnp.abs(out - ref)))
    assert max_err < 6e-2, (max_err, mean_err)
    assert mean_err < 1e-2, (max_err, mean_err)
    print("KERNEL_OK")
</pallas_src>

<mosaic_0001>
module attributes {stable_mosaic.version = 11 : i64} {
  func.func @basic_block_kernel(%arg0: memref<2x18x128xf32, #tpu.memory_space<vmem>>, %arg1: memref<3x128x128xbf16, #tpu.memory_space<vmem>>, %arg2: memref<3x128x128xbf16, #tpu.memory_space<vmem>>, %arg3: memref<128x8xf32, #tpu.memory_space<vmem>>, %arg4: memref<8x128xf32, #tpu.memory_space<vmem>>, %arg5: memref<1x8xf32, #tpu.memory_space<vmem>>, %arg6: memref<1x8xf32, #tpu.memory_space<vmem>>, %arg7: memref<1x8xf32, #tpu.memory_space<vmem>>, %arg8: memref<1x8xf32, #tpu.memory_space<vmem>>, %arg9: memref<2x16x128xf32, #tpu.memory_space<vmem>>, %arg10: memref<2x32x128xf32, #tpu.memory_space<vmem>>) attributes {dimension_semantics = [], scalar_prefetch = 0 : i64, scratch_operands = 1 : i64, tpu.core_type = #tpu.core_type<tc>} {
    %c0 = arith.constant 0 : index
    %c0_0 = arith.constant 0 : index
    %c0_1 = arith.constant 0 : index
    %0 = vector.load %arg0[%c0, %c0_0, %c0_1] : memref<2x18x128xf32, #tpu.memory_space<vmem>>, vector<2x18x128xf32>
    %1 = arith.truncf %0 : vector<2x18x128xf32> to vector<2x18x128xbf16>
    %2 = vector.extract_strided_slice %1 {offsets = [0, 0, 0], sizes = [2, 16, 128], strides = [1, 1, 1]} : vector<2x18x128xbf16> to vector<2x16x128xbf16>
    %3 = vector.shape_cast %2 : vector<2x16x128xbf16> to vector<32x128xbf16>
    %c0_2 = arith.constant 0 : index
    %c0_3 = arith.constant 0 : index
    %c0_4 = arith.constant 0 : index
    %4 = vector.load %arg1[%c0_2, %c0_3, %c0_4] : memref<3x128x128xbf16, #tpu.memory_space<vmem>>, vector<1x128x128xbf16>
    %5 = vector.shape_cast %4 : vector<1x128x128xbf16> to vector<128x128xbf16>
    %cst = arith.constant dense<0.000000e+00> : vector<32x128xf32>
    %6 = tpu.matmul %3, %5, %cst {dimension_numbers = #tpu.dot_dimension_numbers<[1], [0], [0], [1], [0, 0, 1, 1], [], []>} : vector<32x128xbf16>, vector<128x128xbf16>, vector<32x128xf32> -> vector<32x128xf32>
    %7 = vector.extract_strided_slice %1 {offsets = [0, 1, 0], sizes = [2, 16, 128], strides = [1, 1, 1]} : vector<2x18x128xbf16> to vector<2x16x128xbf16>
    %8 = vector.shape_cast %7 : vector<2x16x128xbf16> to vector<32x128xbf16>
    %c1 = arith.constant 1 : index
    %c0_5 = arith.constant 0 : index
    %c0_6 = arith.constant 0 : index
    %9 = vector.load %arg1[%c1, %c0_5, %c0_6] : memref<3x128x128xbf16, #tpu.memory_space<vmem>>, vector<1x128x128xbf16>
    %10 = vector.shape_cast %9 : vector<1x128x128xbf16> to vector<128x128xbf16>
    %cst_7 = arith.constant dense<0.000000e+00> : vector<32x128xf32>
    %11 = tpu.matmul %8, %10, %cst_7 {dimension_numbers = #tpu.dot_dimension_numbers<[1], [0], [0], [1], [0, 0, 1, 1], [], []>} : vector<32x128xbf16>, vector<128x128xbf16>, vector<32x128xf32> -> vector<32x128xf32>
    %12 = arith.addf %6, %11 : vector<32x128xf32>
    %13 = vector.extract_strided_slice %1 {offsets = [0, 2, 0], sizes = [2, 16, 128], strides = [1, 1, 1]} : vector<2x18x128xbf16> to vector<2x16x128xbf16>
    %14 = vector.shape_cast %13 : vector<2x16x128xbf16> to vector<32x128xbf16>
    %c2 = arith.constant 2 : index
    %c0_8 = arith.constant 0 : index
    %c0_9 = arith.constant 0 : index
    %15 = vector.load %arg1[%c2, %c0_8, %c0_9] : memref<3x128x128xbf16, #tpu.memory_space<vmem>>, vector<1x128x128xbf16>
    %16 = vector.shape_cast %15 : vector<1x128x128xbf16> to vector<128x128xbf16>
    %cst_10 = arith.constant dense<0.000000e+00> : vector<32x128xf32>
    %17 = tpu.matmul %14, %16, %cst_10 {dimension_numbers = #tpu.dot_dimension_numbers<[1], [0], [0], [1], [0, 0, 1, 1], [], []>} : vector<32x128xbf16>, vector<128x128xbf16>, vector<32x128xf32> -> vector<32x128xf32>
    %18 = arith.addf %12, %17 : vector<32x128xf32>
    %cst_11 = arith.constant dense<0.000000e+00> : vector<128xf32>
    %19 = vector.multi_reduction <add>, %18, %cst_11 [0] : vector<32x128xf32> to vector<128xf32>
    %20 = vector.shape_cast %19 : vector<128xf32> to vector<1x128xf32>
    %21 = arith.mulf %18, %18 : vector<32x128xf32>
    %cst_12 = arith.constant dense<0.000000e+00> : vector<128xf32>
    %22 = vector.multi_reduction <add>, %21, %cst_12 [0] : vector<32x128xf32> to vector<128xf32>
    %23 = vector.shape_cast %22 : vector<128xf32> to vector<1x128xf32>
    %24 = tpu.concatenate %20, %23 in 0 : vector<1x128xf32>, vector<1x128xf32> -> vector<2x128xf32>
    %c0_13 = arith.constant 0 : index
    %c0_14 = arith.constant 0 : index
    %25 = vector.load %arg3[%c0_13, %c0_14] : memref<128x8xf32, #tpu.memory_space<vmem>>, vector<128x8xf32>
    %cst_15 = arith.constant dense<0.000000e+00> : vector<2x8xf32>
    %26 = tpu.matmul %24, %25, %cst_15 {dimension_numbers = #tpu.dot_dimension_numbers<[1], [0], [0], [1], [0, 0, 1, 1], [], []>} : vector<2x128xf32>, vector<128x8xf32>, vector<2x8xf32> -> vector<2x8xf32>
    %cst_16 = arith.constant 0.001953125 : f32
    %27 = vector.broadcast %cst_16 : f32 to vector<2x8xf32>
    %28 = arith.mulf %26, %27 : vector<2x8xf32>
    %29 = vector.extract_strided_slice %28 {offsets = [0, 0], sizes = [1, 8], strides = [1, 1]} : vector<2x8xf32> to vector<1x8xf32>
    %30 = vector.extract_strided_slice %28 {offsets = [1, 0], sizes = [1, 8], strides = [1, 1]} : vector<2x8xf32> to vector<1x8xf32>
    %31 = arith.mulf %29, %29 : vector<1x8xf32>
    %32 = arith.subf %30, %31 : vector<1x8xf32>
    %c0_17 = arith.constant 0 : index
    %c0_18 = arith.constant 0 : index
    %33 = vector.load %arg5[%c0_17, %c0_18] : memref<1x8xf32, #tpu.memory_space<vmem>>, vector<1x8xf32>
    %cst_19 = arith.constant 9.99999974E-6 : f32
    %34 = vector.broadcast %cst_19 : f32 to vector<1x8xf32>
    %35 = arith.addf %32, %34 : vector<1x8xf32>
    %36 = math.rsqrt %35 : vector<1x8xf32>
    %37 = arith.mulf %33, %36 : vector<1x8xf32>
    %c0_20 = arith.constant 0 : index
    %c0_21 = arith.constant 0 : index
    %38 = vector.load %arg6[%c0_20, %c0_21] : memref<1x8xf32, #tpu.memory_space<vmem>>, vector<1x8xf32>
    %39 = arith.mulf %29, %37 : vector<1x8xf32>
    %40 = arith.subf %38, %39 : vector<1x8xf32>
    %41 = tpu.concatenate %37, %40 in 0 : vector<1x8xf32>, vector<1x8xf32> -> vector<2x8xf32>
    %c0_22 = arith.constant 0 : index
    %c0_23 = arith.constant 0 : index
    %42 = vector.load %arg4[%c0_22, %c0_23] : memref<8x128xf32, #tpu.memory_space<vmem>>, vector<8x128xf32>
    %cst_24 = arith.constant dense<0.000000e+00> : vector<2x128xf32>
    %43 = tpu.matmul %41, %42, %cst_24 {dimension_numbers = #tpu.dot_dimension_numbers<[1], [0], [0], [1], [0, 0, 1, 1], [], []>} : vector<2x8xf32>, vector<8x128xf32>, vector<2x128xf32> -> vector<2x128xf32>
    %44 = vector.extract_strided_slice %43 {offsets = [0, 0], sizes = [1, 128], strides = [1, 1]} : vector<2x128xf32> to vector<1x128xf32>
    %45 = vector.broadcast %44 : vector<1x128xf32> to vector<32x128xf32>
    %46 = arith.mulf %18, %45 : vector<32x128xf32>
    %47 = vector.extract_strided_slice %43 {offsets = [1, 0], sizes = [1, 128], strides = [1, 1]} : vector<2x128xf32> to vector<1x128xf32>
    %48 = vector.broadcast %47 : vector<1x128xf32> to vector<32x128xf32>
    %49 = arith.addf %46, %48 : vector<32x128xf32>
    %cst_25 = arith.constant 0.000000e+00 : f32
    %50 = vector.broadcast %cst_25 : f32 to vector<32x128xf32>
    %51 = arith.maximumf %49, %50 : vector<32x128xf32>
    %cst_26 = arith.constant 0.000000e+00 : f32
    %52 = vector.broadcast %cst_26 : f32 to vector<2x1x128xf32>
    %c0_27 = arith.constant 0 : index
    %c7 = arith.constant 7 : index
    %c0_28 = arith.constant 0 : index
    %53 = vector.load %arg10[%c0_27, %c7, %c0_28] : memref<2x32x128xf32, #tpu.memory_space<vmem>>, vector<2x1x128xf32>
    tpu.vector_store %arg10[%c0_27, %c7, %c0_28], %52 {strides = array<i32>} : memref<2x32x128xf32, #tpu.memory_space<vmem>>, vector<2x1x128xf32>,
    %c0_29 = arith.constant 0 : index
    %c24 = arith.constant 24 : index
    %c0_30 = arith.constant 0 : index
    %54 = vector.load %arg10[%c0_29, %c24, %c0_30] : memref<2x32x128xf32, #tpu.memory_space<vmem>>, vector<2x1x128xf32>
    tpu.vector_store %arg10[%c0_29, %c24, %c0_30], %52 {strides = array<i32>} : memref<2x32x128xf32, #tpu.memory_space<vmem>>, vector<2x1x128xf32>,
    %55 = vector.shape_cast %51 : vector<32x128xf32> to vector<2x16x128xf32>
    %c0_31 = arith.constant 0 : index
    %c8 = arith.constant 8 : index
    %c0_32 = arith.constant 0 : index
    %56 = vector.load %arg10[%c0_31, %c8, %c0_32] : memref<2x32x128xf32, #tpu.memory_space<vmem>>, vector<2x16x128xf32>
    tpu.vector_store %arg10[%c0_31, %c8, %c0_32], %55 {strides = array<i32>} : memref<2x32x128xf32, #tpu.memory_space<vmem>>, vector<2x16x128xf32>,
    %c0_33 = arith.constant 0 : index
    %c7_34 = arith.constant 7 : index
    %c0_35 = arith.constant 0 : index
    %57 = vector.load %arg10[%c0_33, %c7_34, %c0_35] : memref<2x32x128xf32, #tpu.memory_space<vmem>>, vector<2x18x128xf32>
    %58 = arith.truncf %57 : vector<2x18x128xf32> to vector<2x18x128xbf16>
    %59 = vector.extract_strided_slice %58 {offsets = [0, 0, 0], sizes = [2, 16, 128], strides = [1, 1, 1]} : vector<2x18x128xbf16> to vector<2x16x128xbf16>
    %60 = vector.shape_cast %59 : vector<2x16x128xbf16> to vector<32x128xbf16>
    %c0_36 = arith.constant 0 : index
    %c0_37 = arith.constant 0 : index
    %c0_38 = arith.constant 0 : index
    %61 = vector.load %arg2[%c0_36, %c0_37, %c0_38] : memref<3x128x128xbf16, #tpu.memory_space<vmem>>, vector<1x128x128xbf16>
    %62 = vector.shape_cast %61 : vector<1x128x128xbf16> to vector<128x128xbf16>
    %cst_39 = arith.constant dense<0.000000e+00> : vector<32x128xf32>
    %63 = tpu.matmul %60, %62, %cst_39 {dimension_numbers = #tpu.dot_dimension_numbers<[1], [0], [0], [1], [0, 0, 1, 1], [], []>} : vector<32x128xbf16>, vector<128x128xbf16>, vector<32x128xf32> -> vector<32x128xf32>
    %64 = vector.extract_strided_slice %58 {offsets = [0, 1, 0], sizes = [2, 16, 128], strides = [1, 1, 1]} : vector<2x18x128xbf16> to vector<2x16x128xbf16>
    %65 = vector.shape_cast %64 : vector<2x16x128xbf16> to vector<32x128xbf16>
    %c1_40 = arith.constant 1 : index
    %c0_41 = arith.constant 0 : index
    %c0_42 = arith.constant 0 : index
    %66 = vector.load %arg2[%c1_40, %c0_41, %c0_42] : memref<3x128x128xbf16, #tpu.memory_space<vmem>>, vector<1x128x128xbf16>
    %67 = vector.shape_cast %66 : vector<1x128x128xbf16> to vector<128x128xbf16>
    %cst_43 = arith.constant dense<0.000000e+00> : vector<32x128xf32>
    %68 = tpu.matmul %65, %67, %cst_43 {dimension_numbers = #tpu.dot_dimension_numbers<[1], [0], [0], [1], [0, 0, 1, 1], [], []>} : vector<32x128xbf16>, vector<128x128xbf16>, vector<32x128xf32> -> vector<32x128xf32>
    %69 = arith.addf %63, %68 : vector<32x128xf32>
    %70 = vector.extract_strided_slice %58 {offsets = [0, 2, 0], sizes = [2, 16, 128], strides = [1, 1, 1]} : vector<2x18x128xbf16> to vector<2x16x128xbf16>
    %71 = vector.shape_cast %70 : vector<2x16x128xbf16> to vector<32x128xbf16>
    %c2_44 = arith.constant 2 : index
    %c0_45 = arith.constant 0 : index
    %c0_46 = arith.constant 0 : index
    %72 = vector.load %arg2[%c2_44, %c0_45, %c0_46] : memref<3x128x128xbf16, #tpu.memory_space<vmem>>, vector<1x128x128xbf16>
    %73 = vector.shape_cast %72 : vector<1x128x128xbf16> to vector<128x128xbf16>
    %cst_47 = arith.constant dense<0.000000e+00> : vector<32x128xf32>
    %74 = tpu.matmul %71, %73, %cst_47 {dimension_numbers = #tpu.dot_dimension_numbers<[1], [0], [0], [1], [0, 0, 1, 1], [], []>} : vector<32x128xbf16>, vector<128x128xbf16>, vector<32x128xf32> -> vector<32x128xf32>
    %75 = arith.addf %69, %74 : vector<32x128xf32>
    %cst_48 = arith.constant dense<0.000000e+00> : vector<128xf32>
    %76 = vector.multi_reduction <add>, %75, %cst_48 [0] : vector<32x128xf32> to vector<128xf32>
    %77 = vector.shape_cast %76 : vector<128xf32> to vector<1x128xf32>
    %78 = arith.mulf %75, %75 : vector<32x128xf32>
    %cst_49 = arith.constant dense<0.000000e+00> : vector<128xf32>
    %79 = vector.multi_reduction <add>, %78, %cst_49 [0] : vector<32x128xf32> to vector<128xf32>
    %80 = vector.shape_cast %79 : vector<128xf32> to vector<1x128xf32>
    %81 = tpu.concatenate %77, %80 in 0 : vector<1x128xf32>, vector<1x128xf32> -> vector<2x128xf32>
    %c0_50 = arith.constant 0 : index
    %c0_51 = arith.constant 0 : index
    %82 = vector.load %arg3[%c0_50, %c0_51] : memref<128x8xf32, #tpu.memory_space<vmem>>, vector<128x8xf32>
    %cst_52 = arith.constant dense<0.000000e+00> : vector<2x8xf32>
    %83 = tpu.matmul %81, %82, %cst_52 {dimension_numbers = #tpu.dot_dimension_numbers<[1], [0], [0], [1], [0, 0, 1, 1], [], []>} : vector<2x128xf32>, vector<128x8xf32>, vector<2x8xf32> -> vector<2x8xf32>
    %cst_53 = arith.constant 0.001953125 : f32
    %84 = vector.broadcast %cst_53 : f32 to vector<2x8xf32>
    %85 = arith.mulf %83, %84 : vector<2x8xf32>
    %86 = vector.extract_strided_slice %85 {offsets = [0, 0], sizes = [1, 8], strides = [1, 1]} : vector<2x8xf32> to vector<1x8xf32>
    %87 = vector.extract_strided_slice %85 {offsets = [1, 0], sizes = [1, 8], strides = [1, 1]} : vector<2x8xf32> to vector<1x8xf32>
    %88 = arith.mulf %86, %86 : vector<1x8xf32>
    %89 = arith.subf %87, %88 : vector<1x8xf32>
    %c0_54 = arith.constant 0 : index
    %c0_55 = arith.constant 0 : index
    %90 = vector.load %arg7[%c0_54, %c0_55] : memref<1x8xf32, #tpu.memory_space<vmem>>, vector<1x8xf32>
    %cst_56 = arith.constant 9.99999974E-6 : f32
    %91 = vector.broadcast %cst_56 : f32 to vector<1x8xf32>
    %92 = arith.addf %89, %91 : vector<1x8xf32>
    %93 = math.rsqrt %92 : vector<1x8xf32>
    %94 = arith.mulf %90, %93 : vector<1x8xf32>
    %c0_57 = arith.constant 0 : index
    %c0_58 = arith.constant 0 : index
    %95 = vector.load %arg8[%c0_57, %c0_58] : memref<1x8xf32, #tpu.memory_space<vmem>>, vector<1x8xf32>
    %96 = arith.mulf %86, %94 : vector<1x8xf32>
    %97 = arith.subf %95, %96 : vector<1x8xf32>
    %98 = tpu.concatenate %94, %97 in 0 : vector<1x8xf32>, vector<1x8xf32> -> vector<2x8xf32>
    %c0_59 = arith.constant 0 : index
    %c0_60 = arith.constant 0 : index
    %99 = vector.load %arg4[%c0_59, %c0_60] : memref<8x128xf32, #tpu.memory_space<vmem>>, vector<8x128xf32>
    %cst_61 = arith.constant dense<0.000000e+00> : vector<2x128xf32>
    %100 = tpu.matmul %98, %99, %cst_61 {dimension_numbers = #tpu.dot_dimension_numbers<[1], [0], [0], [1], [0, 0, 1, 1], [], []>} : vector<2x8xf32>, vector<8x128xf32>, vector<2x128xf32> -> vector<2x128xf32>
    %101 = vector.extract_strided_slice %100 {offsets = [0, 0], sizes = [1, 128], strides = [1, 1]} : vector<2x128xf32> to vector<1x128xf32>
    %102 = vector.broadcast %101 : vector<1x128xf32> to vector<32x128xf32>
    %103 = arith.mulf %75, %102 : vector<32x128xf32>
    %104 = vector.extract_strided_slice %100 {offsets = [1, 0], sizes = [1, 128], strides = [1, 1]} : vector<2x128xf32> to vector<1x128xf32>
    %105 = vector.broadcast %104 : vector<1x128xf32> to vector<32x128xf32>
    %106 = arith.addf %103, %105 : vector<32x128xf32>
    %c0_62 = arith.constant 0 : index
    %c1_63 = arith.constant 1 : index
    %c0_64 = arith.constant 0 : index
    %107 = vector.load %arg0[%c0_62, %c1_63, %c0_64] : memref<2x18x128xf32, #tpu.memory_space<vmem>>, vector<2x16x128xf32>
    %108 = vector.shape_cast %107 : vector<2x16x128xf32> to vector<32x128xf32>
    %109 = arith.addf %106, %108 : vector<32x128xf32>
    %cst_65 = arith.constant 0.000000e+00 : f32
    %110 = vector.broadcast %cst_65 : f32 to vector<32x128xf32>
    %111 = arith.maximumf %109, %110 : vector<32x128xf32>
    %112 = vector.shape_cast %111 : vector<32x128xf32> to vector<2x16x128xf32>
    %c0_66 = arith.constant 0 : index
    %c0_67 = arith.constant 0 : index
    %c0_68 = arith.constant 0 : index
    %113 = vector.load %arg9[%c0_66, %c0_67, %c0_68] : memref<2x16x128xf32, #tpu.memory_space<vmem>>, vector<2x16x128xf32>
    tpu.vector_store %arg9[%c0_66, %c0_67, %c0_68], %112 {strides = array<i32>} : memref<2x16x128xf32, #tpu.memory_space<vmem>>, vector<2x16x128xf32>,
    return
  }
}

</mosaic_0001>

<bundles_post_ra>
// kernel: tpu_custom_call.1
= control target key start
LH: loop header
LB: loop body
LE: loop exit
PB: predicated region body
PF: predicated region fallthrough
CT: control target
= control target key end

     0   :  { %14 = vsyncpa [#allocation4], 0  ;;  %s2274_s0 = inlined_call_operand.vmem [shape: f32[2,18,128], index: 0, kind: input, shape index: {}]   ;;  %s2275_s1 = inlined_call_operand.vmem [shape: bf16[3,128,128], index: 1, kind: input, shape index: {}]   ;;  %s2276_s2 = inlined_call_operand.hbm [shape: bf16[3,128,128], index: 2, kind: input, shape index: {}]   ;;  %s2277_s3 = inlined_call_operand.vmem [shape: f32[128,8], index: 3, kind: input, shape index: {}]   ;;  %s2278_s4 = inlined_call_operand.vmem [shape: f32[8,128], index: 4, kind: input, shape index: {}]   ;;  %s2279_s5 = inlined_call_operand.vmem [shape: f32[1,8], index: 5, kind: input, shape index: {}]   ;;  %s2280_s6 = inlined_call_operand.vmem [shape: f32[1,8], index: 6, kind: input, shape index: {}]   ;;  %s2281_s7 = inlined_call_operand.vmem [shape: f32[1,8], index: 7, kind: input, shape index: {}]   ;;  %s2282_s8 = inlined_call_operand.vmem [shape: f32[1,8], index: 8, kind: input, shape index: {}]   ;;  %s2283_s9 = inlined_call_operand.hbm [shape: f32[2,16,128], index: 9, kind: output, shape index: {}]  }
   0x1   :  { %15 = vsyncpa [#allocation5], 0  ;;  %s1909_s30 = smov [#allocation3]   ;;  %s1861_s13 = scalar_lea.hbm %s2276_s2, 3072 }
   0x2   :  { %s25_s10 = sshll.u32 %s1909_s30, 4  ;;  %p1862_p0 = scmp.ne.s32.totalorder %s2276_s2, %s1861_s13  ;;  %s26_s10 = int_to_ptr.vmem [resolvable:$true] %s25_s10 }
   0x3   :  { %p1865_p1 = scmp.lt.u32.totalorder %s1861_s13, %s2276_s2 }
   0x5   :  { %p1867_p2 = pnand %p1865_p1, %p1862_p0 }
   0x7   :  { %1870 = shalt.err (!%p1867_p2)
}
   0x8   :  { %s1871_s18 = scalar_lea.vmem %s26_s10, 3072  ;;  %p1876_p4 = scmp.lt.s32.totalorder %s26_s10, %s26_s10 }
   0x9   :  { %p1872_p3 = scmp.ne.s32.totalorder %s26_s10, %s1871_s18  ;;  %p1877_p5 = scmp.lt.s32.totalorder %s1871_s18, %s1871_s18 }
   0xb   :  { %p1878_p6 = por %p1877_p5, %p1876_p4 }
   0xd   :  { %p1879_p7 = pnand %p1878_p6, %p1872_p3 }
   0xf   :  { %1882 = shalt.err (!%p1879_p7)
}
  0x10   :  { %s1910_s19 = smov 64   ;;  %s1911_s20 = smov 4  }
  0x11   :  { %31 = dma.hbm_to_vmem [thread:$0]  %s2276_s2, 3072, %s26_s10, [#allocation4], %s1910_s19, %s1910_s19, %s1911_s20  }
  0x12   :  { %1905 = dma.done.wait [#allocation4], 3072  }
  0x13   :  { %1906 = vsyncadd [#allocation4], 4294964224  ;;  %v1912_v0 = vmov 0.0|0.0   ;;  %v1809_v1 = vld [vmem:[%s2275_s1 + $0x40] sm:$0xff]   ;;  %v1810_v2 = vld [vmem:[%s2275_s1 + $0x48] sm:$0xff]   ;;  %vm316_vm1 = vcmask 1046528  }
  0x14   :  { %1735 = vmatprep.subr.bf16.mxu1 %v1912_v0  ;;  %1535 = vmatprep.subr.bf16.mxu0 %v1809_v1  ;;  %v1811_v3 = vld [vmem:[%s2275_s1 + $0x50] sm:$0xff]   ;;  %v1812_v4 = vld [vmem:[%s2275_s1 + $0x58] sm:$0xff]   ;;  %v48_v5 = vld [vmem:[%s2274_s0] sm:$0xff]  ;;  %vm74_vm0 = vsmask.f32 7424  ;;  %vm1913_vm2 = vmmov 0  }
  0x15   :  { %1536 = vmatpush3.bf16.msra.mxu0 %v1809_v1  ;;  %v49_v6 = vld [vmem:[%s2274_s0 + $0x8] sm:$0xff]  ;;  %v50_v7 = vld [vmem:[%s2274_s0 + $0x10] sm:$0x3]  ;;  %v1813_v10 = vld [vmem:[%s2275_s1 + $0x60] sm:$0xff]   ;;  %vm465_vm3 = vcmask 1040384   ;;  %vm591_vm4 = vcmask 64512  }
  0x16   :  { %1537 = vmatprep.subr.bf16.mxu0 %v1810_v2  ;;  %v2003_v8 = vpack.c.bf16 %v49_v6, %v48_v5  ;;  %v2005_v9 = vpack.c.bf16 %v50_v7, %v50_v7  ;;  %v51_v11 = vld [vmem:[%s2274_s0 + $0x18] sm:$0xff]  ;;  %v52_v15 = vld [vmem:[%s2274_s0 + $0x20] sm:$0xff]  ;;  %v1814_v18 = vld [vmem:[%s2275_s1 + $0x68] sm:$0xff]   ;;  %s1916_s15 = smov [#allocation6]  }
  0x17   :  { %v2022_v20 = vpack.c.bf16 %v52_v15, %v51_v11  ;;  %v53_v21 = vld [vmem:[%s2274_s0 + $0x28] sm:$0x3]  ;;  %v1815_v25 = vld [vmem:[%s2275_s1 + $0x70] sm:$0xff]   ;;  %v1816_v32 = vld [vmem:[%s2275_s1 + $0x78] sm:$0xff]   ;;  %s1343_s16 = sshll.u32 %s1916_s15, 4  ;;  %s1344_s16 = int_to_ptr.vmem [resolvable:$true] %s1343_s16 }
  0x18   :  { %v76_v12 = vshrl.u32 %v2003_v8, 16  ;;  %v78_v13 = vshll.u32 %v2003_v8, 16  ;;  %v83_v14 = vshll.u32 %v2005_v9, 16  ;;  %v57_v23 = vpack.c.bf16 %v53_v21, %v53_v21  ;;  %v1817_v33 = vld [vmem:[%s2275_s1] sm:$0xff]   ;;  %v468_v37 = vld [vmem:[%s2277_s3 + $0x8] sm:$0xff]  ;;  %v469_v38 = vld [vmem:[%s2277_s3 + $0x10] sm:$0xff]  ;;  %p1888_p9 = scmp.lt.s32.totalorder %s1344_s16, %s1344_s16 }
  0x19   :  { %1538 = vmatpush3.bf16.msra.mxu0 %v1810_v2  ;;  %v90_v24 = vshll.u32 %v2022_v20, 16  ;;  %v320_v26 = vrot.slane %v2022_v20, 1  ;;  %v88_v28 = vshrl.u32 %v2022_v20, 16  ;;  %v467_v34 = vld [vmem:[%s2277_s3] sm:$0xff]  ;;  %v470_v39 = vld [vmem:[%s2277_s3 + $0x18] sm:$0xff]  ;;  %v1818_v41 = vld [vmem:[%s2275_s1 + $0x8] sm:$0xff]  }
  0x1a   :  { %1539 = vmatprep.subr.bf16.mxu0 %v1811_v3  ;;  %v80_v16 = vrot.slane %v78_v13, 1  ;;  %v85_v17 = vrot.slane %v83_v14, 1  ;;  %v321_v27 = vrot.slane %v57_v23, 1  ;;  %v95_v30 = vshll.u32 %v57_v23, 16  ;;  %v1819_v44 = vld [vmem:[%s2275_s1 + $0x10] sm:$0xff]   ;;  %v1820_v45 = vld [vmem:[%s2275_s1 + $0x18] sm:$0xff]  }
  0x1b   :  { %v92_v29 = vrot.slane %v90_v24, 1  ;;  %v2055_v40 = vpack.c.bf16 %v468_v37, %v467_v34  ;;  %v1739_v42 = vpack.c.bf16 %v470_v39, %v469_v38  ;;  %v1821_v46 = vld [vmem:[%s2275_s1 + $0x20] sm:$0xff]   ;;  %v1822_v47 = vld [vmem:[%s2275_s1 + $0x28] sm:$0xff]   ;;  %v1823_v48 = vld [vmem:[%s2275_s1 + $0x30] sm:$0xff]   ;;  %v317_v51 = vrot.slane %v2003_v8, 1 }
  0x1c   :  { %v81_v19 = vor.u32 %v80_v16, %v76_v12  ;;  %v2035_v31 = vsel %vm316_vm1, %v320_v26, %v321_v27  ;;  %v97_v36 = vrot.slane %v95_v30, 1  ;;  %v1824_v49 = vld [vmem:[%s2275_s1 + $0x38] sm:$0xff]   ;;  %v1825_v50 = vld [vmem:[%s2275_s1 + $0x80] sm:$0xff]   ;;  %v318_v52 = vrot.slane %v2005_v9, 1  ;;  %v1826_v53 = vld [vmem:[%s2275_s1 + $0x88] sm:$0xff]  }
  0x1d   :  { %1540 = vmatpush3.bf16.msra.mxu0 %v1811_v3  ;;  %v93_v35 = vor.u32 %v92_v29, %v88_v28  ;;  %1737 = vmatpush3.bf16.msra.mxu1 %v2055_v40  ;;  %v1827_v55 = vld [vmem:[%s2275_s1 + $0x90] sm:$0xff]   ;;  %v1828_v56 = vld [vmem:[%s2275_s1 + $0x98] sm:$0xff]   ;;  %v1829_v57 = vld [vmem:[%s2275_s1 + $0xa0] sm:$0xff]   ;;  %v1914_v12 = vmov 0.0  }
  0x1e   :  { %1541 = vmatprep.subr.bf16.mxu0 %v1812_v4  ;;  %v86_v22 = vsel %vm74_vm0, %v81_v19, %v85_v17  ;;  %1738 = vmatprep.subr.bf16.mxu1 %v1912_v0  ;;  %v319_v54 = vsel %vm316_vm1, %v317_v51, %v318_v52  ;;  %v1830_v58 = vld [vmem:[%s2275_s1 + $0xa8] sm:$0xff]   ;;  %v1831_v59 = vld [vmem:[%s2275_s1 + $0xb0] sm:$0xff]   ;;  %v1832_v60 = vld [vmem:[%s2275_s1 + $0xb8] sm:$0xff]   ;;  %686 = vst [vmem:[#allocation2 + $0x27] sm:$0x1] %v1914_v12 }
  0x1f   :  { %1551 = vmatprep.mubr.bf16.mxu0 %v86_v22  ;;  %v98_v43 = vsel %vm74_vm0, %v93_v35, %v97_v36  ;;  %v471_v61 = vld [vmem:[%s2277_s3 + $0x20] sm:$0xff]  ;;  %v472_v62 = vld [vmem:[%s2277_s3 + $0x28] sm:$0xff]  ;;  %v473_v1 = vld [vmem:[%s2277_s3 + $0x30] sm:$0xff]  ;;  %1627 = vmatprep.mubr.msk.f32.mxu1 %vm1913_vm2, %v1914_v12  ;;  %685 = vst [vmem:[#allocation2 + $0x7] sm:$0x1] %v1914_v12 }
  0x20   :  { %v1742_v63 = vpack.c.bf16 %v472_v62, %v471_v61  ;;  %v474_v2 = vld [vmem:[%s2277_s3 + $0x38] sm:$0xff]  ;;  %v476_v5 = vld [vmem:[%s2277_s3 + $0x48] sm:$0xff]  ;;  %v477_v7 = vld [vmem:[%s2277_s3 + $0x50] sm:$0xff]  ;;  %687 = vst [vmem:[#allocation2 + $0x18] sm:$0x1] %v1914_v12 }
  0x21   :  { %1542 = vmatpush3.bf16.msra.mxu0 %v1812_v4  ;;  %1740 = vmatpush3.bf16.msra.mxu1 %v1739_v42  ;;  %v1745_v3 = vpack.c.bf16 %v474_v2, %v473_v1  ;;  %v475_v4 = vld [vmem:[%s2277_s3 + $0x40] sm:$0xff]  ;;  %v480_v11 = vld [vmem:[%s2277_s3 + $0x68] sm:$0xff]  ;;  %688 = vst [vmem:[#allocation2 + $0x38] sm:$0x1] %v1914_v12  ;;  %v481_v14 = vld [vmem:[%s2277_s3 + $0x70] sm:$0xff] }
  0x22   :  { %1543 = vmatprep.subr.bf16.mxu0 %v1813_v10  ;;  %1741 = vmatprep.subr.bf16.mxu1 %v1912_v0  ;;  %v1748_v6 = vpack.c.bf16 %v476_v5, %v475_v4  ;;  %v482_v15 = vld [vmem:[%s2277_s3 + $0x78] sm:$0xff]  ;;  %v1915_v52 = vmov 1966171168   ;;  %v559_v61 = vld [vmem:[%s2279_s5] sm:$0x1] }
  0x23   :  { %v1757_v16 = vpack.c.bf16 %v482_v15, %v481_v14  ;;  %v580_v1 = vld [vmem:[%s2280_s6] sm:$0x1]  ;;  %v1840_v14 = vld [vmem:[#allocation3 + $0x78] sm:$0xff]  }
  0x24   :  { %v1841_v15 = vld [vmem:[#allocation3] sm:$0xff]  }
  0x25   :  { %1544 = vmatpush3.bf16.msra.mxu0 %v1813_v10  ;;  %1743 = vmatpush3.bf16.msra.mxu1 %v1742_v63  ;;  %v479_v10 = vld [vmem:[%s2277_s3 + $0x60] sm:$0xff] }
  0x26   :  { %1545 = vmatprep.subr.bf16.mxu0 %v1814_v18  ;;  %1744 = vmatprep.subr.bf16.mxu1 %v1912_v0  ;;  %v1754_v13 = vpack.c.bf16 %v480_v11, %v479_v10  ;;  %v1837_v10 = vld [vmem:[#allocation3 + $0x60] sm:$0xff]   ;;  %v1838_v11 = vld [vmem:[#allocation3 + $0x68] sm:$0xff]  }
  0x29   :  { %1546 = vmatpush3.bf16.msra.mxu0 %v1814_v18  ;;  %1746 = vmatpush3.bf16.msra.mxu1 %v1745_v3 }
  0x2a   :  { %1547 = vmatprep.subr.bf16.mxu0 %v1815_v25  ;;  %1747 = vmatprep.subr.bf16.mxu1 %v1912_v0 }
  0x2d   :  { %1548 = vmatpush3.bf16.msra.mxu0 %v1815_v25  ;;  %1749 = vmatpush3.bf16.msra.mxu1 %v1748_v6 }
  0x2e   :  { %1549 = vmatprep.subr.bf16.mxu0 %v1816_v32  ;;  %1750 = vmatprep.subr.bf16.mxu1 %v1912_v0 }
  0x31   :  { %1550 = vmatpush3.bf16.msra.mxu0 %v1816_v32 }
  0x32   :  { %1555 = vmatprep.subr.bf16.mxu0 %v1817_v33 }
  0x34   :  { %1552 = vmatmul.mubr.bf16.vlgmr.msra.gmra.mrb[0].mxu0 %v98_v43  ;;  %v2198_v43 = vld [vmem:[%s2278_s4] sm:$0xff] }
  0x35   :  { %1556 = vmatpush3.bf16.msra.mxu0 %v1817_v33  ;;  %1571 = vmatprep.mubr.bf16.mxu0 %v2003_v8  ;;  %v478_v8 = vld [vmem:[%s2277_s3 + $0x58] sm:$0xff] }
  0x36   :  { %1557 = vmatprep.subr.bf16.mxu0 %v1818_v41  ;;  %v1751_v9 = vpack.c.bf16 %v478_v8, %v477_v7  ;;  %v1835_v8 = vld [vmem:[#allocation3 + $0x50] sm:$0xff]  }
  0x38   :  { %1752 = vmatpush3.bf16.msra.mxu1 %v1751_v9 }
  0x39   :  { %1558 = vmatpush3.bf16.msra.mxu0 %v1818_v41  ;;  %1753 = vmatprep.subr.bf16.mxu1 %v1912_v0 }
  0x3a   :  { %1559 = vmatprep.subr.bf16.mxu0 %v1819_v44 }
  0x3c   :  { %1755 = vmatpush3.bf16.msra.mxu1 %v1754_v13 }
  0x3d   :  { %1560 = vmatpush3.bf16.msra.mxu0 %v1819_v44  ;;  %1756 = vmatprep.subr.bf16.mxu1 %v1912_v0  ;;  %v1833_v44 = vld [vmem:[#allocation3 + $0x40] sm:$0xff]  }
  0x3e   :  { %1561 = vmatprep.subr.bf16.mxu0 %v1820_v45 }
  0x40   :  { %1758 = vmatpush3.bf16.msra.mxu1 %v1757_v16 }
  0x41   :  { %1562 = vmatpush3.bf16.msra.mxu0 %v1820_v45  ;;  %1630 = vmatprep.subr.mxu1 %v1914_v12 }
  0x42   :  { %1563 = vmatprep.subr.bf16.mxu0 %v1821_v46 }
  0x45   :  { %1564 = vmatpush3.bf16.msra.mxu0 %v1821_v46 }
  0x46   :  { %1565 = vmatprep.subr.bf16.mxu0 %v1822_v47 }
  0x49   :  { %1566 = vmatpush3.bf16.msra.mxu0 %v1822_v47 }
  0x4a   :  { %1567 = vmatprep.subr.bf16.mxu0 %v1823_v48 }
  0x4d   :  { %1568 = vmatpush3.bf16.msra.mxu0 %v1823_v48 }
  0x4e   :  { %1569 = vmatprep.subr.bf16.mxu0 %v1824_v49 }
  0x51   :  { %1570 = vmatpush3.bf16.msra.mxu0 %v1824_v49 }
  0x52   :  { %1575 = vmatprep.subr.bf16.mxu0 %v1825_v50 }
  0x54   :  { %1572 = vmatmul.mubr.bf16.vlgmr.msra.gmra.mrb[0].mxu0 %v2022_v20 }
  0x55   :  { %1576 = vmatpush3.bf16.msra.mxu0 %v1825_v50  ;;  %1591 = vmatprep.mubr.bf16.mxu0 %v319_v54  ;;  %v566_v54 = vlaneseq }
  0x56   :  { %1577 = vmatprep.subr.bf16.mxu0 %v1826_v53 }
  0x59   :  { %1578 = vmatpush3.bf16.msra.mxu0 %v1826_v53  ;;  %v564_v53 = vunpack.c.l.s4 %v1915_v52 }
  0x5a   :  { %1579 = vmatprep.subr.bf16.mxu0 %v1827_v55 }
  0x5d   :  { %1580 = vmatpush3.bf16.msra.mxu0 %v1827_v55  ;;  %v565_v55 = vunpack.c.0.s8 %v564_v53 }
  0x5e   :  { %1581 = vmatprep.subr.bf16.mxu0 %v1828_v56 }
  0x61   :  { %1582 = vmatpush3.bf16.msra.mxu0 %v1828_v56  ;;  %v2201_v56 = vshrl.u32 %v566_v54, 7 }
  0x62   :  { %1583 = vmatprep.subr.bf16.mxu0 %v1829_v57 }
  0x65   :  { %1584 = vmatpush3.bf16.msra.mxu0 %v1829_v57  ;;  %v2204_v57 = vsub.s32 %v565_v55, %v2201_v56 }
  0x66   :  { %1585 = vmatprep.subr.bf16.mxu0 %v1830_v58 }
  0x69   :  { %1586 = vmatpush3.bf16.msra.mxu0 %v1830_v58 }
  0x6a   :  { %1587 = vmatprep.subr.bf16.mxu0 %v1831_v59 }
  0x6d   :  { %1588 = vmatpush3.bf16.msra.mxu0 %v1831_v59 }
  0x6e   :  { %1589 = vmatprep.subr.bf16.mxu0 %v1832_v60 }
  0x71   :  { %1590 = vmatpush3.bf16.msra.mxu0 %v1832_v60 }
  0x72   :  { %1759 = vmatprep.subr.bf16.mxu0 %v1912_v0 }
  0x74   :  { %1592 = vmatmul.mubr.bf16.vlgmr.msra.gmra.mrb[0].mxu0 %v2035_v31 }
  0x75   :  { %1761 = vmatpush3.bf16.msra.mxu0 %v2055_v40  ;;  %1727 = vmatprep.mubr.msk.f32.mxu0 %vm1913_vm2, %v1914_v12 }
  0x76   :  { %1762 = vmatprep.subr.bf16.mxu0 %v1912_v0 }
  0x79   :  { %1764 = vmatpush3.bf16.msra.mxu0 %v1739_v42 }
  0x7a   :  { %1765 = vmatprep.subr.bf16.mxu0 %v1912_v0 }
  0x7d   :  { %1767 = vmatpush3.bf16.msra.mxu0 %v1742_v63 }
  0x7e   :  { %1768 = vmatprep.subr.bf16.mxu0 %v1912_v0 }
  0x81   :  { %1770 = vmatpush3.bf16.msra.mxu0 %v1745_v3  ;;  %v2215_v3 = vsub.s32 0, %v2201_v56 }
  0x82   :  { %1771 = vmatprep.subr.bf16.mxu0 %v1912_v0 }
  0x85   :  { %1773 = vmatpush3.bf16.msra.mxu0 %v1748_v6  ;;  %v1834_v6 = vld [vmem:[#allocation3 + $0x48] sm:$0xff]  }
  0x86   :  { %1774 = vmatprep.subr.bf16.mxu0 %v1912_v0 }
  0x89   :  { %1776 = vmatpush3.bf16.msra.mxu0 %v1751_v9  ;;  %v1836_v9 = vld [vmem:[#allocation3 + $0x58] sm:$0xff]  }
  0x8a   :  { %1777 = vmatprep.subr.bf16.mxu0 %v1912_v0 }
  0x8d   :  { %1779 = vmatpush3.bf16.msra.mxu0 %v1754_v13  ;;  %v1839_v13 = vld [vmem:[#allocation3 + $0x70] sm:$0xff]  }
  0x8e   :  { %1780 = vmatprep.subr.bf16.mxu0 %v1912_v0 }
  0x91   :  { %1782 = vmatpush3.bf16.msra.mxu0 %v1757_v16  ;;  %v675_v16 = vsub.s32 1, %v2201_v56  ;;  %v1325_v56 = vld [vmem:[%s2274_s0 + $0x21] sm:$0xff] }
  0x92   :  { %1730 = vmatprep.subr.mxu0 %v1914_v12 }
 0x147   :  { %v2172_v17 = vpop.f32.mrb[0].mxu0 }
 0x148   :  { %v2174_v18 = vpop.f32.mrb[1].mxu0  ;;  %v454_v23 = vmul.f32 %v2172_v17, %v2172_v17 }
 0x149   :  { %v2176_v19 = vpop.f32.mrb[2].mxu0  ;;  %v452_v21 = vmul.f32 %v2174_v18, %v2174_v18 }
 0x14a   :  { %v2178_v20 = vpop.f32.mrb[3].mxu0  ;;  %v455_v26 = vmul.f32 %v2176_v19, %v2176_v19 }
 0x14b   :  { %v443_v0 = vadd.f32 %v2178_v20, %v2174_v18  ;;  %v453_v22 = vmul.f32 %v2178_v20, %v2178_v20 }
 0x14d   :  { %v444_v24 = vadd.f32 %v2172_v17, %v443_v0  ;;  %v456_v25 = vadd.f32 %v453_v22, %v452_v21 }
 0x14f   :  { %v445_v27 = vadd.f32 %v2176_v19, %v444_v24  ;;  %v457_v28 = vadd.f32 %v456_v25, %v454_v23 }
 0x151   :  { %v446_v29 = vrot.slane %v445_v27, 4  ;;  %v458_v30 = vadd.f32 %v457_v28, %v455_v26 }
 0x153   :  { %v447_v31 = vadd.f32 %v446_v29, %v445_v27  ;;  %v459_v32 = vrot.slane %v458_v30, 4 }
 0x155   :  { %v448_v33 = vrot.slane %v447_v31, 2  ;;  %v460_v34 = vadd.f32 %v459_v32, %v458_v30 }
 0x157   :  { %v449_v35 = vadd.f32 %v448_v33, %v447_v31  ;;  %v461_v36 = vrot.slane %v460_v34, 2 }
 0x159   :  { %v450_v37 = vrot.slane %v449_v35, 1  ;;  %v462_v38 = vadd.f32 %v461_v36, %v460_v34 }
 0x15b   :  { %v463_v39 = vrot.slane %v462_v38, 1  ;;  %v451_v40 = vadd.f32 %v450_v37, %v449_v35 }
 0x15d   :  { %v464_v41 = vadd.f32 %v463_v39, %v462_v38 }
 0x15f   :  { %v466_v42 = vsel %vm465_vm3, %v451_v40, %v464_v41 }
 0x160   :  { %1628 = vmatmul.mubr.f32.vlgmr.msra.gmra.mrb[0].mxu1 %v466_v42 }
 0x161   :  { %1632 = vmatprep.mubr.msk.f32.mxu1 %vm1913_vm2, %v1914_v12  ;;  %1631 = vmatpush3.msra.mxu1 %v2198_v43 }
 0x162   :  { %1635 = vmatprep.subr.bf16.mxu1 %v1833_v44 }
 0x233   :  { %v549_v45 = vpop.f32.mrb[0].mxu1 }
 0x234   :  { %v553_v46 = vmul.f32 0.001953125, %v549_v45  ;;  %v1629_v47 = vpop.f32.mrb[1].mxu1 }
 0x236   :  { %v554_v48 = vmul.f32 %v553_v46, %v553_v46 }
 0x238   :  { %v556_v49 = vrot.slane %v554_v48, 7 }
 0x23a   :  { %v558_v50 = vsub.f32 %v553_v46, %v556_v49 }
 0x23c   :  { %v560_v51 = vadd.f32 1e-05, %v558_v50 }
 0x23e   :  { %1857 = vrsqrt.f32 %v560_v51 }
 0x248   :  { %v1858_v58 = vpop.eup %1857 }
 0x249   :  { %v569_v59 = vrot.slane %v1858_v58, %v2204_v57 }
 0x24b   :  { %v570_v60 = vcombine.high %v569_v59, %v569_v59 }
 0x24d   :  { %v577_v62 = vrot.slane %v570_v60, %v2204_v57 }
 0x24f   :  { %v579_v63 = vmul.f32 %v577_v62, %v559_v61  ;;  %v1842_v61 = vld [vmem:[#allocation3 + $0x8] sm:$0xff]  }
 0x251   :  { %v581_v2 = vmul.f32 %v579_v63, %v553_v46 }
 0x253   :  { %v582_v4 = vsub.f32 %v580_v1, %v581_v2  ;;  %v1844_v1 = vld [vmem:[#allocation3 + $0x18] sm:$0xff]   ;;  %v1845_v2 = vld [vmem:[#allocation3 + $0x20] sm:$0xff]  }
 0x255   :  { %v587_v5 = vrot.slane %v582_v4, %v2215_v3  ;;  %v1846_v4 = vld [vmem:[#allocation3 + $0x28] sm:$0xff]  }
 0x257   :  { %v589_v7 = vsel %vm465_vm3, %v579_v63, %v587_v5  ;;  %v1843_v63 = vld [vmem:[#allocation3 + $0x10] sm:$0xff]  }
 0x258   :  { %1633 = vmatmul.mubr.msk.f32.vlgmr.msra.gmra.mrb[2].mxu1 %vm591_vm4, %v589_v7  ;;  %v1847_v5 = vld [vmem:[#allocation3 + $0x30] sm:$0xff]   ;;  %v1849_v7 = vld [vmem:[#allocation3 + $0x80] sm:$0xff]  }
 0x259   :  { %1636 = vmatpush3.bf16.msra.mxu1 %v1833_v44 }
 0x25a   :  { %1637 = vmatprep.subr.bf16.mxu1 %v1834_v6 }
 0x25d   :  { %1638 = vmatpush3.bf16.msra.mxu1 %v1834_v6  ;;  %v1848_v6 = vld [vmem:[#allocation3 + $0x38] sm:$0xff]  }
 0x25e   :  { %1639 = vmatprep.subr.bf16.mxu1 %v1835_v8 }
 0x261   :  { %1640 = vmatpush3.bf16.msra.mxu1 %v1835_v8 }
 0x262   :  { %1641 = vmatprep.subr.bf16.mxu1 %v1836_v9 }
 0x265   :  { %1642 = vmatpush3.bf16.msra.mxu1 %v1836_v9 }
 0x266   :  { %1643 = vmatprep.subr.bf16.mxu1 %v1837_v10 }
 0x269   :  { %1644 = vmatpush3.bf16.msra.mxu1 %v1837_v10  ;;  %v1850_v10 = vld [vmem:[#allocation3 + $0x88] sm:$0xff]  }
 0x26a   :  { %1645 = vmatprep.subr.bf16.mxu1 %v1838_v11 }
 0x26d   :  { %1646 = vmatpush3.bf16.msra.mxu1 %v1838_v11 }
 0x26e   :  { %1647 = vmatprep.subr.bf16.mxu1 %v1839_v13 }
 0x271   :  { %1648 = vmatpush3.bf16.msra.mxu1 %v1839_v13  ;;  %v1851_v13 = vld [vmem:[#allocation3 + $0x90] sm:$0xff]  }
 0x272   :  { %1649 = vmatprep.subr.bf16.mxu1 %v1840_v14 }
 0x275   :  { %1650 = vmatpush3.bf16.msra.mxu1 %v1840_v14  ;;  %v1852_v14 = vld [vmem:[#allocation3 + $0x98] sm:$0xff]  }
 0x276   :  { %1655 = vmatprep.subr.bf16.mxu1 %v1841_v15 }
 0x32b   :  { %v661_v21 = vpop.f32.mrb[2].mxu1 }
 0x32c   :  { %v668_v0 = vrot.slane %v661_v21, %v2215_v3  ;;  %v1634_v22 = vpop.f32.mrb[3].mxu1  ;;  %v676_v23 = vrot.slane %v661_v21, %v675_v16  ;;  %v1854_v21 = vld [vmem:[#allocation3 + $0xa8] sm:$0xff]  }
 0x32d   :  { %v1856_v22 = vld [vmem:[#allocation3 + $0xb8] sm:$0xff]  }
 0x32e   :  { %v669_v24 = vmul.f32 %v668_v0, %v2174_v18  ;;  %v670_v25 = vmul.f32 %v668_v0, %v2178_v20  ;;  %v671_v26 = vmul.f32 %v2172_v17, %v668_v0  ;;  %v672_v27 = vmul.f32 %v2176_v19, %v668_v0  ;;  %v1855_v0 = vld [vmem:[#allocation3 + $0xb0] sm:$0xff]  }
 0x330   :  { %v677_v28 = vadd.f32 %v676_v23, %v669_v24  ;;  %v678_v29 = vadd.f32 %v676_v23, %v670_v25  ;;  %v679_v30 = vadd.f32 %v676_v23, %v671_v26  ;;  %v680_v31 = vadd.f32 %v676_v23, %v672_v27 }
 0x332   :  { %v681_v32 = vmax.f32 %v677_v28, 0.0  ;;  %v682_v33 = vmax.f32 %v678_v29, 0.0  ;;  %v683_v34 = vmax.f32 %v679_v30, 0.0  ;;  %v684_v35 = vmax.f32 %v680_v31, 0.0 }
 0x334   :  { %689 = vst [vmem:[#allocation2 + $0x8] sm:$0xff] %v681_v32  ;;  %690 = vst [vmem:[#allocation2 + $0x10] sm:$0xff] %v682_v33 }
 0x335   :  { %691 = vst [vmem:[#allocation2 + $0x28] sm:$0xff] %v683_v34  ;;  %692 = vst [vmem:[#allocation2 + $0x30] sm:$0xff] %v684_v35 }
 0x33b   :  { %v693_v36 = vld [vmem:[#allocation2 + $0x7] sm:$0xff]  ;;  %v694_v18 = vld [vmem:[#allocation2 + $0xf] sm:$0xff]  ;;  %v695_v37 = vld [vmem:[#allocation2 + $0x17] sm:$0x3] }
 0x33c   :  { %v699_v20 = vpack.c.bf16 %v694_v18, %v693_v36  ;;  %v700_v38 = vpack.c.bf16 %v695_v37, %v695_v37  ;;  %v696_v17 = vld [vmem:[#allocation2 + $0x27] sm:$0xff]  ;;  %v697_v39 = vld [vmem:[#allocation2 + $0x2f] sm:$0xff]  ;;  %v698_v19 = vld [vmem:[#allocation2 + $0x37] sm:$0x3] }
 0x33d   :  { %v701_v40 = vpack.c.bf16 %v697_v39, %v696_v17  ;;  %v702_v41 = vpack.c.bf16 %v698_v19, %v698_v19 }
 0x33e   :  { %v722_v42 = vshll.u32 %v699_v20, 16  ;;  %v727_v44 = vshll.u32 %v700_v38, 16  ;;  %v720_v47 = vshrl.u32 %v699_v20, 16  ;;  %v960_v8 = vrot.slane %v699_v20, 1 }
 0x33f   :  { %v734_v45 = vshll.u32 %v701_v40, 16  ;;  %v739_v46 = vshll.u32 %v702_v41, 16  ;;  %v963_v49 = vrot.slane %v701_v40, 1  ;;  %v964_v50 = vrot.slane %v702_v41, 1 }
 0x340   :  { %v724_v48 = vrot.slane %v722_v42, 1  ;;  %v732_v51 = vshrl.u32 %v701_v40, 16  ;;  %v729_v54 = vrot.slane %v727_v44, 1  ;;  %v961_v9 = vrot.slane %v700_v38, 1 }
 0x341   :  { %v736_v52 = vrot.slane %v734_v45, 1  ;;  %v965_v55 = vsel %vm316_vm1, %v963_v49, %v964_v50  ;;  %v741_v59 = vrot.slane %v739_v46, 1 }
 0x342   :  { %v725_v53 = vor.u32 %v724_v48, %v720_v47  ;;  %v962_v11 = vsel %vm316_vm1, %v960_v8, %v961_v9 }
 0x343   :  { %v737_v58 = vor.u32 %v736_v52, %v732_v51 }
 0x344   :  { %v730_v60 = vsel %vm74_vm0, %v725_v53, %v729_v54 }
 0x345   :  { %1651 = vmatprep.mubr.bf16.mxu1 %v730_v60  ;;  %v742_v62 = vsel %vm74_vm0, %v737_v58, %v741_v59  ;;  %v1201_v59 = vld [vmem:[%s2281_s7] sm:$0x1] }
 0x346   :  { %1652 = vmatmul.mubr.bf16.vlgmr.msra.gmra.mrb[4].mxu1 %v742_v62 }
 0x347   :  { %1656 = vmatpush3.bf16.msra.mxu1 %v1841_v15  ;;  %1671 = vmatprep.mubr.bf16.mxu1 %v699_v20  ;;  %v1853_v15 = vld [vmem:[#allocation3 + $0xa0] sm:$0xff]  }
 0x348   :  { %1657 = vmatprep.subr.bf16.mxu1 %v1842_v61 }
 0x34b   :  { %1658 = vmatpush3.bf16.msra.mxu1 %v1842_v61 }
 0x34c   :  { %1659 = vmatprep.subr.bf16.mxu1 %v1843_v63 }
 0x34f   :  { %1660 = vmatpush3.bf16.msra.mxu1 %v1843_v63 }
 0x350   :  { %1661 = vmatprep.subr.bf16.mxu1 %v1844_v1 }
 0x353   :  { %1662 = vmatpush3.bf16.msra.mxu1 %v1844_v1 }
 0x354   :  { %1663 = vmatprep.subr.bf16.mxu1 %v1845_v2 }
 0x357   :  { %1664 = vmatpush3.bf16.msra.mxu1 %v1845_v2 }
 0x358   :  { %1665 = vmatprep.subr.bf16.mxu1 %v1846_v4 }
 0x35b   :  { %1666 = vmatpush3.bf16.msra.mxu1 %v1846_v4 }
 0x35c   :  { %1667 = vmatprep.subr.bf16.mxu1 %v1847_v5 }
 0x35f   :  { %1668 = vmatpush3.bf16.msra.mxu1 %v1847_v5 }
 0x360   :  { %1669 = vmatprep.subr.bf16.mxu1 %v1848_v6 }
 0x363   :  { %1670 = vmatpush3.bf16.msra.mxu1 %v1848_v6 }
 0x364   :  { %1675 = vmatprep.subr.bf16.mxu1 %v1849_v7 }
 0x366   :  { %1672 = vmatmul.mubr.bf16.vlgmr.msra.gmra.mrb[4].mxu1 %v701_v40 }
 0x367   :  { %1676 = vmatpush3.bf16.msra.mxu1 %v1849_v7  ;;  %1691 = vmatprep.mubr.bf16.mxu1 %v962_v11  ;;  %v1323_v11 = vld [vmem:[%s2274_s0 + $0x9] sm:$0xff] }
 0x368   :  { %1677 = vmatprep.subr.bf16.mxu1 %v1850_v10 }
 0x36b   :  { %1678 = vmatpush3.bf16.msra.mxu1 %v1850_v10  ;;  %v1322_v10 = vld [vmem:[%s2274_s0 + $0x1] sm:$0xff] }
 0x36c   :  { %1679 = vmatprep.subr.bf16.mxu1 %v1851_v13 }
 0x36f   :  { %1680 = vmatpush3.bf16.msra.mxu1 %v1851_v13 }
 0x370   :  { %1681 = vmatprep.subr.bf16.mxu1 %v1852_v14 }
 0x373   :  { %1682 = vmatpush3.bf16.msra.mxu1 %v1852_v14 }
 0x374   :  { %1683 = vmatprep.subr.bf16.mxu1 %v1853_v15 }
 0x377   :  { %1684 = vmatpush3.bf16.msra.mxu1 %v1853_v15 }
 0x378   :  { %1685 = vmatprep.subr.bf16.mxu1 %v1854_v21 }
 0x37b   :  { %1686 = vmatpush3.bf16.msra.mxu1 %v1854_v21 }
 0x37c   :  { %1687 = vmatprep.subr.bf16.mxu1 %v1855_v0 }
 0x37f   :  { %1688 = vmatpush3.bf16.msra.mxu1 %v1855_v0 }
 0x380   :  { %1689 = vmatprep.subr.bf16.mxu1 %v1856_v22 }
 0x383   :  { %1690 = vmatpush3.bf16.msra.mxu1 %v1856_v22 }
 0x386   :  { %1692 = vmatmul.mubr.bf16.vlgmr.msra.gmra.mrb[4].mxu1 %v965_v55 }
 0x459   :  { %v1693_v23 = vpop.f32.mrb[4].mxu1 }
 0x45a   :  { %v1067_v24 = vpop.f32.mrb[5].mxu1  ;;  %v1097_v30 = vmul.f32 %v1693_v23, %v1693_v23 }
 0x45b   :  { %v1694_v25 = vpop.f32.mrb[6].mxu1  ;;  %v1095_v27 = vmul.f32 %v1067_v24, %v1067_v24 }
 0x45c   :  { %v1070_v26 = vpop.f32.mrb[7].mxu1  ;;  %v1098_v33 = vmul.f32 %v1694_v25, %v1694_v25 }
 0x45d   :  { %v1086_v28 = vadd.f32 %v1070_v26, %v1067_v24  ;;  %v1096_v29 = vmul.f32 %v1070_v26, %v1070_v26 }
 0x45f   :  { %v1087_v31 = vadd.f32 %v1693_v23, %v1086_v28  ;;  %v1099_v32 = vadd.f32 %v1096_v29, %v1095_v27 }
 0x461   :  { %v1088_v34 = vadd.f32 %v1694_v25, %v1087_v31  ;;  %v1100_v35 = vadd.f32 %v1099_v32, %v1097_v30 }
 0x463   :  { %v1089_v36 = vrot.slane %v1088_v34, 4  ;;  %v1101_v18 = vadd.f32 %v1100_v35, %v1098_v33 }
 0x465   :  { %v1090_v37 = vadd.f32 %v1089_v36, %v1088_v34  ;;  %v1102_v20 = vrot.slane %v1101_v18, 4 }
 0x467   :  { %v1091_v38 = vrot.slane %v1090_v37, 2  ;;  %v1103_v17 = vadd.f32 %v1102_v20, %v1101_v18 }
 0x469   :  { %v1092_v39 = vadd.f32 %v1091_v38, %v1090_v37  ;;  %v1104_v19 = vrot.slane %v1103_v17, 2 }
 0x46b   :  { %v1093_v40 = vrot.slane %v1092_v39, 1  ;;  %v1105_v41 = vadd.f32 %v1104_v19, %v1103_v17 }
 0x46d   :  { %v1106_v42 = vrot.slane %v1105_v41, 1  ;;  %v1094_v44 = vadd.f32 %v1093_v40, %v1092_v39 }
 0x46f   :  { %v1107_v45 = vadd.f32 %v1106_v42, %v1105_v41 }
 0x471   :  { %v1108_v46 = vsel %vm465_vm3, %v1094_v44, %v1107_v45 }
 0x472   :  { %1728 = vmatmul.mubr.f32.vlgmr.msra.gmra.mrb[4].mxu0 %v1108_v46 }
 0x473   :  { %1731 = vmatpush3.msra.mxu0 %v2198_v43  ;;  %1732 = vmatprep.mubr.msk.f32.mxu0 %vm1913_vm2, %v1914_v12  ;;  %v1222_v12 = vld [vmem:[%s2282_s8] sm:$0x1] }
 0x545   :  { %v1191_v47 = vpop.f32.mrb[4].mxu0 }
 0x546   :  { %v1195_v48 = vmul.f32 0.001953125, %v1191_v47  ;;  %v1729_v49 = vpop.f32.mrb[5].mxu0 }
 0x548   :  { %v1196_v50 = vmul.f32 %v1195_v48, %v1195_v48 }
 0x54a   :  { %v1198_v51 = vrot.slane %v1196_v50, 7 }
 0x54c   :  { %v1200_v52 = vsub.f32 %v1195_v48, %v1198_v51 }
 0x54e   :  { %v1202_v53 = vadd.f32 1e-05, %v1200_v52 }
 0x550   :  { %1859 = vrsqrt.f32 %v1202_v53 }
 0x55a   :  { %v1860_v54 = vpop.eup %1859 }
 0x55b   :  { %v1211_v55 = vrot.slane %v1860_v54, %v2204_v57 }
 0x55d   :  { %v1212_v58 = vcombine.high %v1211_v55, %v1211_v55 }
 0x55f   :  { %v1219_v43 = vrot.slane %v1212_v58, %v2204_v57 }
 0x561   :  { %v1221_v60 = vmul.f32 %v1219_v43, %v1201_v59 }
 0x563   :  { %v1223_v61 = vmul.f32 %v1221_v60, %v1195_v48 }
 0x565   :  { %v1224_v62 = vsub.f32 %v1222_v12, %v1223_v61 }
 0x567   :  { %v1229_v63 = vrot.slane %v1224_v62, %v2215_v3 }
 0x569   :  { %v1231_v1 = vsel %vm465_vm3, %v1221_v60, %v1229_v63 }
 0x56a   :  { %1733 = vmatmul.mubr.msk.f32.vlgmr.msra.gmra.mrb[6].mxu0 %vm591_vm4, %v1231_v1 }
 0x63d   :  { %v1302_v2 = vpop.f32.mrb[6].mxu0 }
 0x63e   :  { %v1309_v4 = vrot.slane %v1302_v2, %v2215_v3  ;;  %v1734_v5 = vpop.f32.mrb[7].mxu0  ;;  %v1317_v57 = vrot.slane %v1302_v2, %v675_v16  ;;  %v1324_v3 = vld [vmem:[%s2274_s0 + $0x19] sm:$0xff]  ;;  %s1883_s0 = scalar_lea.vmem %s1344_s16, 512 }
 0x63f   :  { %p1884_p8 = scmp.ne.s32.totalorder %s1344_s16, %s1883_s0  ;;  %p1889_p10 = scmp.lt.s32.totalorder %s1883_s0, %s1883_s0 }
 0x640   :  { %v1310_v6 = vmul.f32 %v1309_v4, %v1067_v24  ;;  %v1311_v7 = vmul.f32 %v1309_v4, %v1070_v26  ;;  %v1312_v8 = vmul.f32 %v1693_v23, %v1309_v4  ;;  %v1313_v9 = vmul.f32 %v1694_v25, %v1309_v4 }
 0x641   :  { %p1890_p11 = por %p1889_p10, %p1888_p9 }
 0x642   :  { %v1318_v16 = vadd.f32 %v1317_v57, %v1310_v6  ;;  %v1319_v13 = vadd.f32 %v1317_v57, %v1311_v7  ;;  %v1320_v14 = vadd.f32 %v1317_v57, %v1312_v8  ;;  %v1321_v15 = vadd.f32 %v1317_v57, %v1313_v9 }
 0x643   :  { %p1891_p12 = pnand %p1890_p11, %p1884_p8 }
 0x644   :  { %v1326_v21 = vadd.f32 %v1322_v10, %v1318_v16  ;;  %v1327_v0 = vadd.f32 %v1323_v11, %v1319_v13  ;;  %v1328_v22 = vadd.f32 %v1324_v3, %v1320_v14  ;;  %v1329_v23 = vadd.f32 %v1325_v56, %v1321_v15 }
 0x646   :  { %v1330_v24 = vmax.f32 %v1326_v21, 0.0  ;;  %v1331_v25 = vmax.f32 %v1327_v0, 0.0  ;;  %v1332_v26 = vmax.f32 %v1328_v22, 0.0  ;;  %v1333_v27 = vmax.f32 %v1329_v23, 0.0 }
 0x648   :  { %1334 = vst [vmem:[#allocation6] sm:$0xff] %v1330_v24  ;;  %1335 = vst [vmem:[#allocation6 + $0x8] sm:$0xff] %v1331_v25 }
 0x649   :  { %1336 = vst [vmem:[#allocation6 + $0x10] sm:$0xff] %v1332_v26  ;;  %1337 = vst [vmem:[#allocation6 + $0x18] sm:$0xff] %v1333_v27 }
 0x64a   :  { %1894 = shalt.err (!%p1891_p12)
}
 0x64b   :  { %s1895_s19 = scalar_lea.hbm %s2283_s9, 512 }
 0x64c   :  { %p1896_p13 = scmp.ne.s32.totalorder %s2283_s9, %s1895_s19  ;;  %p1899_p0 = scmp.lt.u32.totalorder %s1895_s19, %s2283_s9 }
 0x64e   :  { %p1901_p1 = pnand %p1899_p0, %p1896_p13 }
 0x650   :  { %1904 = shalt.err (!%p1901_p1)
}
 0x651   :  { %s1917_s24 = smov 128   ;;  %s1918_s25 = smov 8  }
 0x652   :  { %1349 = dma.vmem_to_hbm [thread:$0]  %s1344_s16, 512, %s2283_s9, [#allocation5], %s1917_s24, %s1917_s24, %s1918_s25  }
 0x653   :  { %1907 = dma.done.wait [#allocation5], 512  }
 0x654   :  { %1908 = vsyncadd [#allocation5], 4294966784 }
 0x655   :  { %1353 = vsyncpa [#allocation4], 1 }
 0x656   :  { %1354 = vsyncpa [#allocation5], 1 }

</bundles_post_ra>
